<compile_context>
chip_gen: v7x
topology: tpu7x:2x2x1
jax: 0.10.0
libtpu: 0.0.40
codegen_flags: <defaults>
</compile_context>

<pallas_src>
import functools

import jax
import jax.numpy as jnp
from jax.experimental import pallas as pl
from jax.experimental.pallas import tpu as pltpu


# --------------------------------------------------------------------------- #
# Fused single-pass kernel: whole (Bt, C, HW) image block resident in VMEM.    #
# --------------------------------------------------------------------------- #
def _cca_fused_kernel(x_ref, w1t_ref, b1_ref, w2t_ref, b2_ref, o_ref):
    # x_ref block: (Bt, C, HW) with HW on lanes.
    hw = x_ref.shape[-1]
    inv_hw = 1.0 / hw

    # --- contrast() + adaptive avg pool: per-(batch, channel) spatial stats ---
    # Stats are streamed from the resident input buffer (cast per expression);
    # no full-block f32 value is kept live across the whole body.
    feat_mean = jnp.sum(x_ref[...].astype(jnp.float32), axis=-1,
                        keepdims=True) * inv_hw                       # (Bt, C, 1)
    feat_diff = jnp.abs(x_ref[...].astype(jnp.float32) - feat_mean) + 0.001
    feat_pow_sum = jnp.sum(feat_diff * feat_diff, axis=-1, keepdims=True) * inv_hw
    feat_var = jnp.sqrt(feat_pow_sum)                                  # (Bt, C, 1)
    # torch.nan_to_num(nan=0.001, posinf=0.001, neginf=0.001)
    feat_var = jnp.where(jnp.isfinite(feat_var), feat_var, 0.001)
    y = (feat_var + feat_mean)[..., 0]                                 # (Bt, C)

    # --- conv_du: 1x1 convs over channels == tiny channel MLP, batched over Bt ---
    h1 = jnp.dot(y, w1t_ref[...], preferred_element_type=jnp.float32) + b1_ref[...]
    h1 = jnp.maximum(h1, 0.0)                                          # (Bt, Cr)
    z = jnp.dot(h1, w2t_ref[...], preferred_element_type=jnp.float32) + b2_ref[...]
    z = jax.nn.sigmoid(z)                                              # (Bt, C)

    # --- x * z: re-read the resident input buffer; f32 multiply for parity ----
    o_ref[...] = (x_ref[...].astype(jnp.float32) * z[..., None]).astype(o_ref.dtype)


# --------------------------------------------------------------------------- #
# Two-pass HW-tiled path (large images): stats kernel + scale kernel.          #
# --------------------------------------------------------------------------- #
def _cca_stats_kernel(hw_total, x_ref, w1t_ref, b1_ref, w2t_ref, b2_ref,
                      z_ref, acc_sc, mean_sc):
    # grid = (B, 2, nhw): axis 1 is the pass (0 = mean, 1 = variance), axis 2 is
    # the HW tile.  x_ref block: (1, C, HWt).  Accumulators are per-b scratch.
    p = pl.program_id(1)
    h = pl.program_id(2)
    nhw = pl.num_programs(2)
    hw_tile = x_ref.shape[-1]
    inv_hw = 1.0 / hw_total

    @pl.when(jnp.logical_and(p == 0, h == 0))
    def _():
        acc_sc[...] = jnp.zeros_like(acc_sc)

    @pl.when(jnp.logical_and(p == 1, h == 0))
    def _():
        mean_sc[...] = acc_sc[...] * inv_hw
        acc_sc[...] = jnp.zeros_like(acc_sc)

    # Mask lanes beyond the true H*W (the last HW tile may be padded).
    lane = jax.lax.broadcasted_iota(jnp.int32, x_ref.shape, dimension=2)
    valid = (h * hw_tile + lane) < hw_total
    xf = x_ref[...].astype(jnp.float32)

    @pl.when(p == 0)
    def _():
        acc_sc[...] += jnp.sum(jnp.where(valid, xf, 0.0), axis=-1, keepdims=True)

    @pl.when(p == 1)
    def _():
        d = jnp.abs(xf - mean_sc[...]) + 0.001
        acc_sc[...] += jnp.sum(jnp.where(valid, d * d, 0.0), axis=-1, keepdims=True)

    @pl.when(jnp.logical_and(p == 1, h == nhw - 1))
    def _():
        feat_var = jnp.sqrt(acc_sc[...] * inv_hw)
        feat_var = jnp.where(jnp.isfinite(feat_var), feat_var, 0.001)
        y = (feat_var + mean_sc[...])[..., 0]                          # (1, C)
        h1 = jnp.dot(y, w1t_ref[...], preferred_element_type=jnp.float32) + b1_ref[...]
        h1 = jnp.maximum(h1, 0.0)
        z = jnp.dot(h1, w2t_ref[...], preferred_element_type=jnp.float32) + b2_ref[...]
        z = jax.nn.sigmoid(z)                                          # (1, C)
        z_ref[...] = z[..., None]                                      # (1, C, 1)


def _cca_scale_kernel(x_ref, z_ref, o_ref):
    # x_ref block (1, C, HWt); z_ref block (1, C, 1) broadcasts over lanes.
    o_ref[...] = (x_ref[...].astype(jnp.float32) * z_ref[...]).astype(o_ref.dtype)


# --------------------------------------------------------------------------- #
# Generation-aware budgeting.                                                  #
# --------------------------------------------------------------------------- #
def _tpu_budget():
    """Returns (target_block_bytes, vmem_limit_cap_bytes, preferred_grid_steps)."""
    vmem_bytes = None
    try:
        info = pltpu.get_tpu_info()
        for name in ("vmem_capacity_bytes", "vmem_bytes", "vmem_size_bytes"):
            v = getattr(info, name, None)
            if v:
                vmem_bytes = int(v)
                break
    except Exception:
        vmem_bytes = None
    if vmem_bytes is None:
        try:
            kind = jax.devices()[0].device_kind.lower()
        except Exception:
            kind = ""
        if "v5" in kind or "v6" in kind:
            vmem_bytes = 128 << 20
        else:
            vmem_bytes = 64 << 20       # conservative: v7x-class or unknown

    cap = max(16 << 20, vmem_bytes - (12 << 20))   # leave Mosaic scratch headroom
    if vmem_bytes <= (64 << 20):
        # v7x-class: 64 MiB VMEM per TC, 2 TensorCores, ~3.2 TB/s HBM.
        return (7 << 20, min(cap, 52 << 20), 4)
    # v5e / v6e: 128 MiB VMEM, single TensorCore.
    return (14 << 20, min(cap, 100 << 20), 1)


# --------------------------------------------------------------------------- #
# Wrappers.                                                                    #
# --------------------------------------------------------------------------- #
def _cca_two_pass(x_slab, w1t, b1r, w2t, b2r, out_dtype, target_block, vmem_cap,
                  hw_tile, donate_x):
    B, C, HW = x_slab.shape
    Cr = w1t.shape[1]
    itemsize = jnp.dtype(x_slab.dtype).itemsize

    if hw_tile is None:
        hwt = (target_block // max(C * itemsize, 1)) // 128 * 128
    else:
        hwt = (int(hw_tile) // 128) * 128
    hwt = max(128, hwt)
    hwt = min(hwt, pl.cdiv(HW, 128) * 128)
    nhw = pl.cdiv(HW, hwt)

    blk = C * hwt * itemsize
    blk_f32 = C * hwt * 4

    # ---- pass 1: spatial stats (2 sweeps over HW) + channel MLP -> z(B,C,1) ----
    stats_vmem = int(min(max(2 * blk + 2 * blk_f32 + (2 << 20), 16 << 20), vmem_cap))
    z = pl.pallas_call(
        functools.partial(_cca_stats_kernel, HW),
        out_shape=jax.ShapeDtypeStruct((B, C, 1), jnp.float32),
        grid_spec=pltpu.PrefetchScalarGridSpec(
            num_scalar_prefetch=0,
            grid=(B, 2, nhw),
            in_specs=[
                pl.BlockSpec((1, C, hwt), lambda b, p, h: (b, 0, h)),
                pl.BlockSpec((C, Cr), lambda b, p, h: (0, 0)),
                pl.BlockSpec((1, Cr), lambda b, p, h: (0, 0)),
                pl.BlockSpec((Cr, C), lambda b, p, h: (0, 0)),
                pl.BlockSpec((1, C), lambda b, p, h: (0, 0)),
            ],
            out_specs=pl.BlockSpec((1, C, 1), lambda b, p, h: (b, 0, 0)),
            scratch_shapes=[pltpu.VMEM((1, C, 1), jnp.float32),   # running sum
                            pltpu.VMEM((1, C, 1), jnp.float32)],  # mean
        ),
        compiler_params=pltpu.CompilerParams(
            dimension_semantics=("parallel", "arbitrary", "arbitrary"),
            vmem_limit_bytes=stats_vmem,
        ),
    )(x_slab, w1t, b1r, w2t, b2r)

    # ---- pass 2: out = x * z, streamed over (B, HW) tiles ----------------------
    scale_vmem = int(min(max(4 * blk + blk_f32 + (2 << 20), 16 << 20), vmem_cap))
    out_slab = pl.pallas_call(
        _cca_scale_kernel,
        out_shape=jax.ShapeDtypeStruct((B, C, HW), out_dtype),
        grid_spec=pltpu.PrefetchScalarGridSpec(
            num_scalar_prefetch=0,
            grid=(B, nhw),
            in_specs=[
                pl.BlockSpec((1, C, hwt), lambda b, h: (b, 0, h)),
                pl.BlockSpec((1, C, 1), lambda b, h: (b, 0, 0)),
            ],
            out_specs=pl.BlockSpec((1, C, hwt), lambda b, h: (b, 0, h)),
        ),
        compiler_params=pltpu.CompilerParams(
            dimension_semantics=("parallel", "parallel"),
            vmem_limit_bytes=scale_vmem,
        ),
        input_output_aliases=({0: 0} if donate_x else {}),
    )(x_slab, z)
    return out_slab


def cca_forward(x_nchw, w1, b1, w2, b2, *, donate_x=False, force_two_pass=False,
                hw_tile=None):
    """x_nchw: (B, C, H, W). w1: (Cr, C), b1: (Cr,), w2: (C, Cr), b2: (C,)."""
    B, C, H, W = x_nchw.shape
    Cr = w1.shape[0]
    HW = H * W
    itemsize = jnp.dtype(x_nchw.dtype).itemsize

    # Pure reshape (no transpose): (B, C, H, W) -> (B, C, HW); HW sits on lanes.
    x_slab = x_nchw.reshape(B, C, HW)
    w1t = w1.T                      # (C, Cr)
    w2t = w2.T                      # (Cr, C)
    b1r = b1.reshape(1, Cr)
    b2r = b2.reshape(1, C)

    target_block, vmem_cap, prefer_steps = _tpu_budget()
    per_batch = C * HW * itemsize
    per_batch_f32 = C * HW * 4

    def fused_need(bt):
        # in/out blocks double-buffered + f32 working set (upcast + |x-mean| temp)
        # + weights / slack.
        return 4 * bt * per_batch + 2 * bt * per_batch_f32 + (2 << 20)

    if force_two_pass or fused_need(1) > vmem_cap:
        out_slab = _cca_two_pass(x_slab, w1t, b1r, w2t, b2r, x_nchw.dtype,
                                 target_block, vmem_cap, hw_tile, donate_x)
        return out_slab.reshape(B, C, H, W)

    # ---- fused single-pass path -------------------------------------------------
    max_bt_target = max(1, target_block // max(per_batch, 1))
    max_bt_cap = max(1, (vmem_cap - (2 << 20)) //
                     max(4 * per_batch + 2 * per_batch_f32, 1))
    bt = int(max(1, min(B, max_bt_target, max_bt_cap)))
    if prefer_steps > 1 and B >= 2:
        # Multi-TensorCore generation: keep several grid steps so both cores work.
        bt = min(bt, pl.cdiv(B, min(prefer_steps, B)))
    grid = (pl.cdiv(B, bt),)        # cdiv tiling: padded last block is harmless
    vmem_limit = int(min(max(fused_need(bt), 16 << 20), vmem_cap))

    out_slab = pl.pallas_call(
        _cca_fused_kernel,
        out_shape=jax.ShapeDtypeStruct((B, C, HW), x_nchw.dtype),
        grid_spec=pltpu.PrefetchScalarGridSpec(
            num_scalar_prefetch=0,
            grid=grid,
            in_specs=[
                pl.BlockSpec((bt, C, HW), lambda b: (b, 0, 0)),
                pl.BlockSpec((C, Cr), lambda b: (0, 0)),
                pl.BlockSpec((1, Cr), lambda b: (0, 0)),
                pl.BlockSpec((Cr, C), lambda b: (0, 0)),
                pl.BlockSpec((1, C), lambda b: (0, 0)),
            ],
            out_specs=pl.BlockSpec((bt, C, HW), lambda b: (b, 0, 0)),
        ),
        compiler_params=pltpu.CompilerParams(
            dimension_semantics=("parallel",),
            vmem_limit_bytes=vmem_limit,
        ),
        input_output_aliases=({0: 0} if donate_x else {}),
    )(x_slab, w1t, b1r, w2t, b2r)

    return out_slab.reshape(B, C, H, W)


def cca_reference(x, w1, b1, w2, b2):
    """Pure-JAX reference of the PyTorch forward (NCHW)."""
    B, C, H, W = x.shape
    hw = H * W
    xf = x.astype(jnp.float32)
    feat_mean = jnp.sum(xf, axis=(2, 3), keepdims=True) / hw
    feat_diff = jnp.abs(xf - feat_mean) + 0.001
    feat_var = jnp.sqrt(jnp.sum(feat_diff * feat_diff, axis=(2, 3), keepdims=True) / hw)
    feat_var = jnp.where(jnp.isfinite(feat_var), feat_var, 0.001)
    y = (feat_var + feat_mean).reshape(B, C)
    h1 = jnp.maximum(y @ w1.T + b1, 0.0)
    z = jax.nn.sigmoid(h1 @ w2.T + b2).reshape(B, C, 1, 1)
    return (xf * z).astype(x.dtype)


if __name__ == "__main__":
    # Shapes consistent with CCA(n_feat=32, k_size=1, reduction=16).
    B, C, H, W = 2, 32, 16, 16
    reduction = 16
    Cr = C // reduction

    key = jax.random.PRNGKey(0)
    kx, k1, k2, k3, k4 = jax.random.split(key, 5)
    x = jax.random.normal(kx, (B, C, H, W), dtype=jnp.float32)
    # Conv 1x1 weights => dense over channels.
    w1 = jax.random.normal(k1, (Cr, C), dtype=jnp.float32) * 0.2   # conv1 weight (Cr,C,1,1)
    b1 = jax.random.normal(k2, (Cr,), dtype=jnp.float32) * 0.1     # conv1 bias
    w2 = jax.random.normal(k3, (C, Cr), dtype=jnp.float32) * 0.2   # conv2 weight (C,Cr,1,1)
    b2 = jax.random.normal(k4, (C,), dtype=jnp.float32) * 0.1      # conv2 bias

    # 1) Fused single-pass path (whole image resident per block).
    ref = cca_reference(x, w1, b1, w2, b2)
    out = jax.block_until_ready(cca_forward(x, w1, b1, w2, b2))
    assert out.shape == (B, C, H, W)
    assert jnp.allclose(out, ref, rtol=1e-5, atol=1e-5), "fused path mismatch"

    # 2) Two-pass HW-tiled large-image path, forced at a small, ragged spatial
    #    size (HW=208 -> two 128-lane tiles, last one masked) to verify it.
    H2, W2 = 16, 13
    x2 = jax.random.normal(kx, (B, C, H2, W2), dtype=jnp.float32)
    ref2 = cca_reference(x2, w1, b1, w2, b2)
    out2 = jax.block_until_ready(
        cca_forward(x2, w1, b1, w2, b2, force_two_pass=True, hw_tile=128))
    assert out2.shape == (B, C, H2, W2)
    assert jnp.allclose(out2, ref2, rtol=1e-5, atol=1e-5), "two-pass path mismatch"

    print("KERNEL_OK")
</pallas_src>

<mosaic_0001>
module attributes {stable_mosaic.version = 11 : i64} {
  func.func @_cca_fused_kernel(%arg0: i32, %arg1: memref<1x32x256xf32, #tpu.memory_space<vmem>>, %arg2: memref<32x2xf32, #tpu.memory_space<vmem>>, %arg3: memref<1x2xf32, #tpu.memory_space<vmem>>, %arg4: memref<2x32xf32, #tpu.memory_space<vmem>>, %arg5: memref<1x32xf32, #tpu.memory_space<vmem>>, %arg6: memref<1x32x256xf32, #tpu.memory_space<vmem>>) attributes {dimension_semantics = [#tpu.dimension_semantics<parallel>], iteration_bounds = array<i64: 2>, scalar_prefetch = 0 : i64, scratch_operands = 0 : i64, tpu.core_type = #tpu.core_type<tc>, window_params = [{transform_indices = @transform_0, window_bounds = array<i64: 1, 32, 256>}, {pipeline_mode = #tpu.pipeline_mode<synchronous>, transform_indices = @transform_1, window_bounds = array<i64: 32, 2>}, {pipeline_mode = #tpu.pipeline_mode<synchronous>, transform_indices = @transform_2, window_bounds = array<i64: 1, 2>}, {pipeline_mode = #tpu.pipeline_mode<synchronous>, transform_indices = @transform_3, window_bounds = array<i64: 2, 32>}, {pipeline_mode = #tpu.pipeline_mode<synchronous>, transform_indices = @transform_4, window_bounds = array<i64: 1, 32>}, {transform_indices = @transform_5, window_bounds = array<i64: 1, 32, 256>}]} {
    %c0 = arith.constant 0 : index
    %c0_0 = arith.constant 0 : index
    %c0_1 = arith.constant 0 : index
    %0 = vector.load %arg1[%c0, %c0_0, %c0_1] : memref<1x32x256xf32, #tpu.memory_space<vmem>>, vector<1x32x256xf32>
    %cst = arith.constant dense<0.000000e+00> : vector<1x32xf32>
    %1 = vector.multi_reduction <add>, %0, %cst [2] : vector<1x32x256xf32> to vector<1x32xf32>
    %2 = vector.shape_cast %1 : vector<1x32xf32> to vector<1x32x1xf32>
    %cst_2 = arith.constant 3.906250e-03 : f32
    %3 = vector.broadcast %cst_2 : f32 to vector<1x32x1xf32>
    %4 = arith.mulf %2, %3 : vector<1x32x1xf32>
    %c0_3 = arith.constant 0 : index
    %c0_4 = arith.constant 0 : index
    %c0_5 = arith.constant 0 : index
    %5 = vector.load %arg1[%c0_3, %c0_4, %c0_5] : memref<1x32x256xf32, #tpu.memory_space<vmem>>, vector<1x32x256xf32>
    %6 = vector.broadcast %4 : vector<1x32x1xf32> to vector<1x32x256xf32>
    %7 = arith.subf %5, %6 : vector<1x32x256xf32>
    %8 = math.absf %7 : vector<1x32x256xf32>
    %cst_6 = arith.constant 1.000000e-03 : f32
    %9 = vector.broadcast %cst_6 : f32 to vector<1x32x256xf32>
    %10 = arith.addf %8, %9 : vector<1x32x256xf32>
    %11 = arith.mulf %10, %10 : vector<1x32x256xf32>
    %cst_7 = arith.constant dense<0.000000e+00> : vector<1x32xf32>
    %12 = vector.multi_reduction <add>, %11, %cst_7 [2] : vector<1x32x256xf32> to vector<1x32xf32>
    %13 = vector.shape_cast %12 : vector<1x32xf32> to vector<1x32x1xf32>
    %cst_8 = arith.constant 3.906250e-03 : f32
    %14 = vector.broadcast %cst_8 : f32 to vector<1x32x1xf32>
    %15 = arith.mulf %13, %14 : vector<1x32x1xf32>
    %16 = math.sqrt %15 : vector<1x32x1xf32>
    %17 = tpu.weird %16 : vector<1x32x1xf32> -> vector<1x32x1xi1>
    %cst_9 = arith.constant dense<true> : vector<1x32x1xi1>
    %18 = arith.xori %17, %cst_9 : vector<1x32x1xi1>
    %cst_10 = arith.constant 1.000000e-03 : f32
    %19 = vector.broadcast %cst_10 : f32 to vector<1x32x1xf32>
    %20 = arith.select %18, %16, %19 : vector<1x32x1xi1>, vector<1x32x1xf32>
    %21 = arith.addf %20, %4 : vector<1x32x1xf32>
    %22 = vector.shape_cast %21 : vector<1x32x1xf32> to vector<1x32xf32>
    %c0_11 = arith.constant 0 : index
    %c0_12 = arith.constant 0 : index
    %23 = vector.load %arg2[%c0_11, %c0_12] : memref<32x2xf32, #tpu.memory_space<vmem>>, vector<32x2xf32>
    %cst_13 = arith.constant dense<0.000000e+00> : vector<1x2xf32>
    %24 = tpu.matmul %22, %23, %cst_13 {dimension_numbers = #tpu.dot_dimension_numbers<[1], [0], [0], [1], [0, 0, 1, 1], [], []>} : vector<1x32xf32>, vector<32x2xf32>, vector<1x2xf32> -> vector<1x2xf32>
    %c0_14 = arith.constant 0 : index
    %c0_15 = arith.constant 0 : index
    %25 = vector.load %arg3[%c0_14, %c0_15] : memref<1x2xf32, #tpu.memory_space<vmem>>, vector<1x2xf32>
    %26 = arith.addf %24, %25 : vector<1x2xf32>
    %cst_16 = arith.constant 0.000000e+00 : f32
    %27 = vector.broadcast %cst_16 : f32 to vector<1x2xf32>
    %28 = arith.maximumf %26, %27 : vector<1x2xf32>
    %c0_17 = arith.constant 0 : index
    %c0_18 = arith.constant 0 : index
    %29 = vector.load %arg4[%c0_17, %c0_18] : memref<2x32xf32, #tpu.memory_space<vmem>>, vector<2x32xf32>
    %cst_19 = arith.constant dense<0.000000e+00> : vector<1x32xf32>
    %30 = tpu.matmul %28, %29, %cst_19 {dimension_numbers = #tpu.dot_dimension_numbers<[1], [0], [0], [1], [0, 0, 1, 1], [], []>} : vector<1x2xf32>, vector<2x32xf32>, vector<1x32xf32> -> vector<1x32xf32>
    %c0_20 = arith.constant 0 : index
    %c0_21 = arith.constant 0 : index
    %31 = vector.load %arg5[%c0_20, %c0_21] : memref<1x32xf32, #tpu.memory_space<vmem>>, vector<1x32xf32>
    %32 = arith.addf %30, %31 : vector<1x32xf32>
    %33 = arith.negf %32 : vector<1x32xf32>
    %34 = math.exp %33 : vector<1x32xf32>
    %cst_22 = arith.constant 1.000000e+00 : f32
    %35 = vector.broadcast %cst_22 : f32 to vector<1x32xf32>
    %36 = arith.addf %35, %34 : vector<1x32xf32>
    %37 = arith.divf %35, %36 : vector<1x32xf32>
    %c0_23 = arith.constant 0 : index
    %c0_24 = arith.constant 0 : index
    %c0_25 = arith.constant 0 : index
    %38 = vector.load %arg1[%c0_23, %c0_24, %c0_25] : memref<1x32x256xf32, #tpu.memory_space<vmem>>, vector<1x32x256xf32>
    %39 = vector.shape_cast %37 : vector<1x32xf32> to vector<1x32x1xf32>
    %40 = vector.broadcast %39 : vector<1x32x1xf32> to vector<1x32x256xf32>
    %41 = arith.mulf %38, %40 : vector<1x32x256xf32>
    %c0_26 = arith.constant 0 : index
    %c0_27 = arith.constant 0 : index
    %c0_28 = arith.constant 0 : index
    %42 = vector.load %arg6[%c0_26, %c0_27, %c0_28] : memref<1x32x256xf32, #tpu.memory_space<vmem>>, vector<1x32x256xf32>
    tpu.vector_store %arg6[%c0_26, %c0_27, %c0_28], %41 {strides = array<i32>} : memref<1x32x256xf32, #tpu.memory_space<vmem>>, vector<1x32x256xf32>,
    return
  }
  func.func @transform_0(%arg0: i32) -> (i32, i32, i32) {
    %c0_i32 = arith.constant 0 : i32
    %c0_i32_0 = arith.constant 0 : i32
    %c0_i32_1 = arith.constant 0 : i32
    return %arg0, %c0_i32, %c0_i32_0 : i32, i32, i32
  }
  func.func @transform_1(%arg0: i32) -> (i32, i32) {
    %c0_i32 = arith.constant 0 : i32
    %c0_i32_0 = arith.constant 0 : i32
    %c0_i32_1 = arith.constant 0 : i32
    return %c0_i32, %c0_i32_0 : i32, i32
  }
  func.func @transform_2(%arg0: i32) -> (i32, i32) {
    %c0_i32 = arith.constant 0 : i32
    %c0_i32_0 = arith.constant 0 : i32
    %c0_i32_1 = arith.constant 0 : i32
    return %c0_i32, %c0_i32_0 : i32, i32
  }
  func.func @transform_3(%arg0: i32) -> (i32, i32) {
    %c0_i32 = arith.constant 0 : i32
    %c0_i32_0 = arith.constant 0 : i32
    %c0_i32_1 = arith.constant 0 : i32
    return %c0_i32, %c0_i32_0 : i32, i32
  }
  func.func @transform_4(%arg0: i32) -> (i32, i32) {
    %c0_i32 = arith.constant 0 : i32
    %c0_i32_0 = arith.constant 0 : i32
    %c0_i32_1 = arith.constant 0 : i32
    return %c0_i32, %c0_i32_0 : i32, i32
  }
  func.func @transform_5(%arg0: i32) -> (i32, i32, i32) {
    %c0_i32 = arith.constant 0 : i32
    %c0_i32_0 = arith.constant 0 : i32
    %c0_i32_1 = arith.constant 0 : i32
    return %arg0, %c0_i32, %c0_i32_0 : i32, i32, i32
  }
}

</mosaic_0001>

<bundles_post_ra>
// kernel: tpu_custom_call.1
= control target key start
LH: loop header
LB: loop body
LE: loop exit
PB: predicated region body
PF: predicated region fallthrough
CT: control target
= control target key end

     0   :  { %10 = vsyncpa [#allocation3], 0  ;;  %s1194_s0 = inlined_call_operand.hbm [shape: f32[2,32,256], index: 0, kind: input, shape index: {}]   ;;  %s1195_s1 = inlined_call_operand.vmem [shape: f32[32,2], index: 1, kind: input, shape index: {}]   ;;  %s1196_s2 = inlined_call_operand.vmem [shape: f32[1,2], index: 2, kind: input, shape index: {}]   ;;  %s1197_s3 = inlined_call_operand.vmem [shape: f32[2,32], index: 3, kind: input, shape index: {}]   ;;  %s1198_s4 = inlined_call_operand.vmem [shape: f32[1,32], index: 4, kind: input, shape index: {}]   ;;  %s1199_s5 = inlined_call_operand.hbm [shape: f32[2,32,256], index: 5, kind: output, shape index: {}]  }
   0x1   :  { %12 = vsyncpa [#allocation3 + $0x1], 0 }
   0x2   :  { %13 = vsyncpa [#allocation4], 0 }
   0x3   :  { %15 = vsyncpa [#allocation4 + $0x1], 0  ;;  %s930_s18 = smov 0   ;;  %s932_s19 = smov 0  }
   0x4   :  { %s934_s20 = smov 0   ;;  %s936_s21 = smov 0  }
   0x5 LB: > { %s951_s22 = sadd.s32 4294967295, %s888_s21   ;;  %s677_s23 = sadd.s32 4294967294, %s888_s21   ;;  %s888_s21 = sphi %s936_s21, %s1214_s21   ;;  %s884_s20 = sphi %s934_s20, %s1213_s20   ;;  %s880_s19 = sphi %s932_s19, %s1212_s19   ;;  %s876_s18 = sphi %s930_s18, %s1211_s18  }
   0x6   : > { %s955_s24 = sadd.s32 1, %s888_s21   ;;  %s28_s25 = sadd.s32 1, %s884_s20 }
   0x7   : > { %s25_s26 = ssub.s32 %s888_s21, %s955_s24  ;;  %p35_p0 = scmp.ne.s32.totalorder %s884_s20, %s880_s19 }
   0x8   : > { %p26_p1 = scmp.eq.s32.totalorder %s25_s26, 0  ;;  %p36_p2 = scmp.eq.s32.totalorder %s888_s21, 0 }
   0x9   : > { %p41_p3 = scmp.ne.s32.totalorder %s880_s19, %s876_s18  ;;  %p42_p4 = scmp.eq.s32.totalorder %s951_s22, 0 }
   0xa   : > { %s967_s27 = scalar_select %p26_p1, %s884_s20, %s28_s25  }
   0xb   : > { %p969_p5 = por %p36_p2, %p35_p0  ;;  %p973_p6 = por %p42_p4, %p41_p3 }
   0xc   : > { %p149_p7 = scmp.eq.s32.totalorder %s951_s22, 1  ;;  %p155_p8 = scmp.eq.s32.totalorder %s677_s23, 1 }
   0xd   : > { %p738_p10 = scmp.lt.s32.totalorder %s888_s21, 2  ;;  %s187_s7 = sand.u32 1, %s884_s20  }
   0xe   : > { %p980_p11 = por %p149_p7, %p35_p0  ;;  %p984_p12 = por %p155_p8, %p41_p3 }
   0xf   : > { %s695_s8 = sshll.u32 %s888_s21, 10  ;;  %s680_s9 = sshll.u32 %s187_s7, 6 }
  0x10   : > { %s1203_s30 = scalar_select %p980_p11, 1, 0 }
  0x11   : > { %s1204_s6 = scalar_select %p984_p12, 1, 0 }
  0x12   : > { %s993_s12 = scalar_lea.hbm %s1194_s0, %s695_s8  ;;  %s191_s13 = scalar_lea.vmem [#allocation2], %s680_s9 }
  0x13   : > { %s198_s14 = sshll.u32 %s191_s13, 4  ;;  %p997_p13 = pnand %p738_p10, %p969_p5  ;;  %s1001_s14 = int_to_ptr.vmem [resolvable:$true] %s198_s14 }
  0x14   : > { %s1003_s16 = scalar_lea.sflag [#allocation3], %s187_s7  ;;  %s792_s17 = scalar_lea.hbm %s993_s12, 1024 }
  0x15   : > { %p793_p0 = scmp.ne.s32.totalorder %s993_s12, %s792_s17  ;;  %p794_p1 = pneg %p997_p13 }
  0x16   : > { %s797_s26 = scalar_lea.hbm %s1194_s0, 2048  ;;  %p798_p4 = scmp.lt.u32.totalorder %s993_s12, %s1194_s0 }
  0x17   : > { %p795_p2 = pnand %p794_p1, %p793_p0  ;;  %p799_p5 = scmp.lt.u32.totalorder %s797_s26, %s792_s17 }
  0x18   : > { %p801_p8 = scmp.lt.u32.totalorder %s792_s17, %s993_s12 }
  0x19   : > { %p796_p3 = pneg %p795_p2  ;;  %p800_p7 = por %p799_p5, %p798_p4 }
  0x1b   : > { %p802_p10 = por %p801_p8, %p800_p7 }
  0x1d   : > { %p803_p9 = pnand %p802_p10, %p796_p3 }
  0x1f   : > { %806 = shalt.err (!%p803_p9)
}
  0x20   : > { %s807_s7 = scalar_lea.vmem %s1001_s14, 1024  ;;  %s890_s9 = smov [#allocation2]  }
  0x21   : > { %p808_p0 = scmp.ne.s32.totalorder %s1001_s14, %s807_s7  ;;  %s812_s10 = sshll.u32 %s890_s9, 4  ;;  %s813_s10 = int_to_ptr.vmem [resolvable:$false] %s812_s10 }
  0x22   : > { %s814_s11 = scalar_lea.vmem %s813_s10, 2048  ;;  %p815_p11 = scmp.lt.s32.totalorder %s1001_s14, %s813_s10 }
  0x23   : > { %p810_p2 = pnand %p808_p0, %p794_p1  ;;  %p816_p4 = scmp.lt.s32.totalorder %s814_s11, %s807_s7 }
  0x25   : > { %p811_p12 = pneg %p810_p2  ;;  %p817_p5 = por %p816_p4, %p815_p11 }
  0x27   : > { %p818_p7 = pnand %p817_p5, %p811_p12 }
  0x29   : > { %821 = shalt.err (!%p818_p7)
}
  0x2a   : > { %s891_s13 = smov 256   ;;  %s892_s17 = smov 16  }
  0x2b   : > { %733 = dma.hbm_to_vmem [thread:$0]  (!%p997_p13), %s993_s12, 1024, %s1001_s14, %s1003_s16, %s891_s13, %s891_s13, %s892_s17  }
  0x2c   : > { %p683_p9 = scmp.ge.s32.totalorder %s888_s21, 1  ;;  %p206_p1 = scmp.lt.s32.totalorder %s888_s21, 3 }
  0x2e   : > { %p207_p3 = pnand %p683_p9, %p206_p1 }
  0x2f   : > { %s1034_s23 = sand.u32 (!%p207_p3), 1, %s880_s19  }
  0x30   : > { %210 = sbr.rel (%p207_p3) target bundleno = 986 (0x3da), region = 40  ;;  %s684_s25 = sshll.u32 (!%p207_p3), %s1034_s23, 6 }
  0x31   : > { %s213_s26 = scalar_lea.sflag (!%p207_p3), [#allocation3], %s1034_s23  ;;  %s216_s28 = scalar_lea.vmem (!%p207_p3), [#allocation2], %s684_s25 }
  0x37   : > { %867 = dma.done.wait (%p973_p6), %s213_s26, 1024  }
  0x38   : > { %869 = vsyncadd (%p973_p6), %s213_s26, 4294966272  ;;  %v1044_v0 = vld [vmem:[%s216_s28] sm:$0xff]  ;;  %v1046_v1 = vld [vmem:[%s216_s28 + $0x8] sm:$0xff]  ;;  %v893_v59 = vmov 0.0|0.0   ;;  %vm894_vm0 = vmmov 0   ;;  %v895_v62 = vmov 0.0  }
  0x39   : > { %v1048_v2 = vld [vmem:[%s216_s28 + $0x20] sm:$0xff]  ;;  %v251_v3 = vadd.f32 %v1046_v1, %v1044_v0  ;;  %v1052_v4 = vld [vmem:[%s216_s28 + $0x28] sm:$0xff]  ;;  %v1054_v5 = vld [vmem:[%s216_s28 + $0x10] sm:$0xff]  ;;  %720 = vmatprep.subr.bf16.mxu0 %v893_v59  ;;  %712 = vmatprep.mubr.msk.f32.mxu0 %vm894_vm0, %v895_v62  ;;  %vm896_vm6 = vmmov 1   ;;  %s242_s29 = scalar_lea.vmem [#allocation5], %s684_s25  ;;  %s696_s14 = sshll.u32 %s951_s22, 10 }
  0x3a   : > { %v1056_v6 = vld [vmem:[%s216_s28 + $0x18] sm:$0xff]  ;;  %v257_v7 = vadd.f32 %v1052_v4, %v1048_v2  ;;  %v1060_v8 = vld [vmem:[%s216_s28 + $0x30] sm:$0xff]  ;;  %v359_v56 = vld [vmem:[%s1195_s1] sm:$0xff]  ;;  %715 = vmatprep.subr.mxu1 %v895_v62  ;;  %717 = vmatprep.mubr.msk.f32.mxu1 %vm894_vm0, %v895_v62  ;;  %s604_s12 = sshll.u32 %s242_s29, 4  ;;  %s1148_s16 = scalar_lea.hbm %s1199_s5, %s696_s14  ;;  %s1143_s12 = int_to_ptr.vmem [resolvable:$true] %s604_s12 }
  0x3b   : > { %v1062_v9 = vld [vmem:[%s216_s28 + $0x38] sm:$0xff]  ;;  %252 = vadd.xlane.f32.xlu0 %v251_v3  ;;  %v254_v10 = vadd.f32 %v1056_v6, %v1054_v5  ;;  %v360_v57 = vld [vmem:[%s1195_s1 + $0x8] sm:$0xff]  ;;  %v361_v58 = vld [vmem:[%s1195_s1 + $0x10] sm:$0xff]  ;;  %s591_s22 = scalar_lea.sflag [#allocation4], %s1034_s23  ;;  %s822_s8 = scalar_lea.vmem %s1143_s12, 1024 }
  0x3c   : > { %258 = vadd.xlane.f32.xlu1 %v257_v7  ;;  %v260_v11 = vadd.f32 %v1062_v9, %v1060_v8  ;;  %v721_v60 = vpack.c.bf16 %v360_v57, %v359_v56  ;;  %v362_v61 = vld [vmem:[%s1195_s1 + $0x18] sm:$0xff]  ;;  %p823_p6 = scmp.ne.s32.totalorder %s1143_s12, %s822_s8  ;;  %p1208_p11 = scmp.ne.s32.totalorder %s1203_s30, 0 }
  0x3d   : > { %v724_v63 = vpack.c.bf16 %v362_v61, %v361_v58  ;;  %s897_s7 = smov [#allocation5]  }
  0x3e   : > { %722 = vmatpush3.bf16.msra.mxu0 %v721_v60  ;;  %p824_p12 = pnand %p823_p6, %p1208_p11  ;;  %s826_s9 = sshll.u32 %s897_s7, 4  ;;  %s827_s9 = int_to_ptr.vmem [resolvable:$false] %s826_s9 }
  0x3f   : > { %255 = vadd.xlane.f32.xlu0 %v254_v10  ;;  %723 = vmatprep.subr.bf16.mxu0 %v893_v59  ;;  %s828_s10 = scalar_lea.vmem %s827_s9, 2048  ;;  %p829_p8 = scmp.lt.s32.totalorder %s1143_s12, %s827_s9 }
  0x40   : > { %261 = vadd.xlane.f32.xlu1 %v260_v11  ;;  %p825_p13 = pneg %p824_p12  ;;  %p830_p10 = scmp.lt.s32.totalorder %s828_s10, %s822_s8 }
  0x42   : > { %725 = vmatpush3.bf16.msra.mxu0 %v724_v63  ;;  %p831_p0 = por %p830_p10, %p829_p8 }
  0x44   : > { %p832_p2 = pnand %p831_p0, %p825_p13 }
  0xc8   : > { %v253_v12 = vpop.xlane.xlu0 %252 }
  0xc9   : > { %v1068_v13 = vmul.f32 0.00390625, %v253_v12  ;;  %v259_v14 = vpop.xlane.xlu1 %258 }
  0xca   : > { %v1070_v15 = vmul.f32 0.00390625, %v259_v14 }
  0xcb   : > { %v267_v16 = vsub.f32 %v1044_v0, %v1068_v13  ;;  %v268_v17 = vsub.f32 %v1046_v1, %v1068_v13 }
  0xcc   : > { %v256_v18 = vpop.xlane.xlu0 %255  ;;  %v271_v19 = vsub.f32 %v1048_v2, %v1070_v15  ;;  %v272_v20 = vsub.f32 %v1052_v4, %v1070_v15 }
  0xcd   : > { %v1080_v21 = vmul.f32 0.00390625, %v256_v18  ;;  %v262_v22 = vpop.xlane.xlu1 %261  ;;  %v275_v23 = vand.u32 2147483647, %v267_v16  ;;  %v276_v24 = vand.u32 2147483647, %v268_v17  ;;  %v368_v18 = vlaneseq }
  0xce   : > { %v1082_v25 = vmul.f32 0.00390625, %v262_v22  ;;  %v279_v26 = vand.u32 2147483647, %v271_v19  ;;  %v280_v27 = vand.u32 2147483647, %v272_v20 }
  0xcf   : > { %v283_v28 = vadd.f32 0.001, %v275_v23  ;;  %v284_v29 = vadd.f32 0.001, %v276_v24  ;;  %v269_v30 = vsub.f32 %v1054_v5, %v1080_v21  ;;  %v270_v31 = vsub.f32 %v1056_v6, %v1080_v21 }
  0xd0   : > { %v287_v32 = vadd.f32 0.001, %v279_v26  ;;  %v288_v33 = vadd.f32 0.001, %v280_v27  ;;  %v273_v34 = vsub.f32 %v1060_v8, %v1082_v25  ;;  %v274_v35 = vsub.f32 %v1062_v9, %v1082_v25 }
  0xd1   : > { %v291_v36 = vmul.f32 %v283_v28, %v283_v28  ;;  %v292_v37 = vmul.f32 %v284_v29, %v284_v29  ;;  %v277_v38 = vand.u32 2147483647, %v269_v30  ;;  %v278_v39 = vand.u32 2147483647, %v270_v31 }
  0xd2   : > { %v295_v40 = vmul.f32 %v287_v32, %v287_v32  ;;  %v296_v41 = vmul.f32 %v288_v33, %v288_v33  ;;  %v281_v42 = vand.u32 2147483647, %v273_v34  ;;  %v282_v43 = vand.u32 2147483647, %v274_v35 }
  0xd3   : > { %v299_v44 = vadd.f32 %v292_v37, %v291_v36  ;;  %v285_v45 = vadd.f32 0.001, %v277_v38  ;;  %v286_v46 = vadd.f32 0.001, %v278_v39  ;;  %v369_v22 = vand.u32 127, %v368_v18 }
  0xd4   : > { %v289_v47 = vadd.f32 0.001, %v281_v42  ;;  %v290_v48 = vadd.f32 0.001, %v282_v43  ;;  %v305_v49 = vadd.f32 %v296_v41, %v295_v40  ;;  %v1104_v23 = vshrl.u32 %v368_v18, 7 }
  0xd5   : > { %300 = vadd.xlane.f32.xlu0 %v299_v44  ;;  %v293_v50 = vmul.f32 %v285_v45, %v285_v45  ;;  %v294_v51 = vmul.f32 %v286_v46, %v286_v46  ;;  %v374_v29 = vadd.s32 4294967288, %v369_v22  ;;  %v381_v33 = vadd.s32 4294967280, %v369_v22 }
  0xd6   : > { %v297_v52 = vmul.f32 %v289_v47, %v289_v47  ;;  %v298_v53 = vmul.f32 %v290_v48, %v290_v48  ;;  %v372_v32 = vsub.s32 %v369_v22, %v1104_v23  ;;  %v388_v46 = vadd.s32 4294967272, %v369_v22 }
  0xd7   : > { %v302_v54 = vadd.f32 %v294_v51, %v293_v50  ;;  %v377_v43 = vsub.s32 %v374_v29, %v1104_v23  ;;  %v384_v51 = vsub.s32 %v381_v33, %v1104_v23  ;;  %v557_v22 = vsub.s32 0, %v1104_v23 }
  0xd8   : > { %v308_v55 = vadd.f32 %v298_v53, %v297_v52 }
  0xd9   : > { %306 = vadd.xlane.f32.xlu0 %v305_v49  ;;  %303 = vadd.xlane.f32.xlu1 %v302_v54 }
  0xdd   : > { %309 = vadd.xlane.f32.xlu1 %v308_v55 }
 0x162   : > { %v301_v3 = vpop.xlane.xlu0 %300 }
 0x163   : > { %v311_v7 = vmul.f32 0.00390625, %v301_v3  ;;  %v363_v3 = vld [vmem:[%s1196_s2] sm:$0x1] }
 0x165   : > { %780 = vrsqrt.f32 %v311_v7  ;;  %vm317_vm1 = vcmp.eq.f32.partialorder %v311_v7, inf  ;;  %v320_v24 = vand.u32 2147483648, %v311_v7  ;;  %vm319_vm2 = vcmp.eq.f32.partialorder %v311_v7, 0.0 }
 0x166   : > { %v304_v10 = vpop.xlane.xlu1 %303  ;;  %v307_v11 = vpop.xlane.xlu0 %306 }
 0x167   : > { %v312_v12 = vmul.f32 0.00390625, %v304_v10  ;;  %v313_v14 = vmul.f32 0.00390625, %v307_v11 }
 0x169   : > { %782 = vrsqrt.f32 %v312_v12  ;;  %vm324_vm4 = vcmp.eq.f32.partialorder %v312_v12, inf  ;;  %vm326_vm5 = vcmp.eq.f32.partialorder %v312_v12, 0.0  ;;  %v327_v34 = vand.u32 2147483648, %v312_v12 }
 0x16a   : > { %784 = vrsqrt.f32 %v313_v14  ;;  %v310_v16 = vpop.xlane.xlu1 %309  ;;  %vm331_vm8 = vcmp.eq.f32.partialorder %v313_v14, inf  ;;  %v334_v38 = vand.u32 2147483648, %v313_v14  ;;  %vm333_vm9 = vcmp.eq.f32.partialorder %v313_v14, 0.0 }
 0x16b   : > { %v314_v17 = vmul.f32 0.00390625, %v310_v16 }
 0x16d   : > { %786 = vrsqrt.f32 %v314_v17  ;;  %vm338_vm11 = vcmp.eq.f32.partialorder %v314_v17, inf  ;;  %v341_v47 = vand.u32 2147483648, %v314_v17  ;;  %vm340_vm14 = vcmp.eq.f32.partialorder %v314_v17, 0.0 }
 0x16f   : > { %v781_v19 = vpop.eup %780 }
 0x170   : > { %v316_v20 = vmul.f32 %v781_v19, %v311_v7 }
 0x172   : > { %v318_v26 = vsel %vm317_vm1, %v311_v7, %v316_v20  ;;  %vm379_vm1 = vcmask 130112  }
 0x173   : > { %v783_v27 = vpop.eup %782  ;;  %v321_v28 = vsel %vm319_vm2, %v320_v24, %v318_v26 }
 0x174   : > { %v785_v30 = vpop.eup %784  ;;  %v323_v31 = vmul.f32 %v783_v27, %v312_v12  ;;  %vm343_vm3 = vweird.f32 %v321_v28 }
 0x175   : > { %v330_v35 = vmul.f32 %v785_v30, %v313_v14  ;;  %vm1108_vm7 = vmxor %vm343_vm3, %vm896_vm6  ;;  %vm386_vm3 = vcmask 195712  }
 0x176   : > { %v325_v37 = vsel %vm324_vm4, %v312_v12, %v323_v31  ;;  %v351_v39 = vsel %vm1108_vm7, %v321_v28, 0.001  ;;  %vm393_vm4 = vcmask 261312   ;;  %vm471_vm7 = vcmask 15360   ;;  %v470_v12 = vld [vmem:[%s1198_s4] sm:$0x1] }
 0x177   : > { %v787_v40 = vpop.eup %786  ;;  %v328_v41 = vsel %vm326_vm5, %v327_v34, %v325_v37  ;;  %v332_v42 = vsel %vm331_vm8, %v313_v14, %v330_v35  ;;  %v355_v48 = vadd.f32 %v351_v39, %v1068_v13  ;;  %v391_v13 = vsub.s32 %v388_v46, %v1104_v23 }
 0x178   : > { %v337_v44 = vmul.f32 %v787_v40, %v314_v17  ;;  %v335_v45 = vsel %vm333_vm9, %v334_v38, %v332_v42  ;;  %vm344_vm10 = vweird.f32 %v328_v41  ;;  %vm395_vm5 = vcmask 261120  }
 0x179   : > { %vm345_vm12 = vweird.f32 %v335_v45  ;;  %vm348_vm13 = vmxor %vm344_vm10, %vm896_vm6  ;;  %v373_v56 = vrot.slane %v355_v48, %v372_v32 }
 0x17a   : > { %v339_v49 = vsel %vm338_vm11, %v314_v17, %v337_v44  ;;  %vm349_vm15 = vmxor %vm345_vm12, %vm896_vm6  ;;  %v352_v50 = vsel %vm348_vm13, %v328_v41, 0.001 }
 0x17b   : > { %v342_v52 = vsel %vm340_vm14, %v341_v47, %v339_v49  ;;  %v353_v53 = vsel %vm349_vm15, %v335_v45, 0.001  ;;  %v356_v54 = vadd.f32 %v352_v50, %v1080_v21 }
 0x17c   : > { %vm346_vm0 = vweird.f32 %v342_v52  ;;  %v357_v55 = vadd.f32 %v353_v53, %v1070_v15  ;;  %v469_v15 = vld [vmem:[%s1197_s3] sm:$0x3] }
 0x17d   : > { %vm350_vm2 = vmxor %vm346_vm0, %vm896_vm6  ;;  %v378_v57 = vrot.slane %v356_v54, %v377_v43  ;;  %vm475_vm6 = vcmask 1041408  }
 0x17e   : > { %v354_v58 = vsel %vm350_vm2, %v342_v52, 0.001  ;;  %v385_v59 = vrot.slane %v357_v55, %v384_v51  ;;  %716 = vmatpush3.msk.msra.mxu1 %vm475_vm6, %v469_v15 }
 0x17f   : > { %v358_v60 = vadd.f32 %v354_v58, %v1082_v25  ;;  %v380_v61 = vsel %vm379_vm1, %v378_v57, %v373_v56 }
 0x180   : > { %v387_v21 = vsel %vm386_vm3, %v385_v59, %v380_v61 }
 0x181   : > { %v392_v62 = vrot.slane %v358_v60, %v391_v13 }
 0x183   : > { %v394_v63 = vsel %vm393_vm4, %v392_v62, %v387_v21 }
 0x184   : > { %713 = vmatmul.mubr.msk.f32.vlgmr.msra.gmra.mrb[0].mxu0 %vm395_vm5, %v394_v63 }
 0x257   : > { %v464_v7 = vpop.f32.mrb[0].mxu0 }
 0x258   : > { %v465_v25 = vadd.f32 %v464_v7, %v363_v3  ;;  %v714_v10 = vpop.f32.mrb[1].mxu0 }
 0x25a   : > { %v468_v11 = vmax.f32 %v465_v25, 0.0 }
 0x25c   : > { %718 = vmatmul.mubr.msk.f32.vlgmr.msra.gmra.mrb[0].mxu1 %vm471_vm7, %v468_v11 }
 0x32f   : > { %v545_v14 = vpop.f32.mrb[0].mxu1 }
 0x330   : > { %v546_v16 = vadd.f32 %v545_v14, %v470_v12  ;;  %v719_v17 = vpop.f32.mrb[1].mxu1 }
 0x332   : > { %v689_v18 = vmul.f32 -1.442695, %v546_v16 }
 0x334   : > { %788 = vpow2.f32 %v689_v18 }
 0x33e   : > { %v789_v19 = vpop.eup %788 }
 0x33f   : > { %v552_v20 = vadd.f32 1.0, %v789_v19 }
 0x341   : > { %790 = vrcp.f32 %v552_v20 }
 0x34b   : > { %v791_v24 = vpop.eup %790 }
 0x34c   : > { %v558_v26 = vrot.slane %v791_v24, %v557_v22 }
 0x34e   : > { %564 = vbcast.lane.b32.xlu1 %v558_v26, 264  ;;  %560 = vbcast.lane.b32.xlu0 %v558_v26, 256 }
 0x352   : > { %568 = vbcast.lane.b32.xlu1 %v558_v26, 272 }
 0x356   : > { %572 = vbcast.lane.b32.xlu1 %v558_v26, 280 }
 0x3c0   : > { %v565_v27 = vpop.permute.xlu1 %564  ;;  %v561_v28 = vpop.permute.xlu0 %560 }
 0x3c1   : > { %v576_v29 = vmul.f32 %v565_v27, %v1054_v5  ;;  %v577_v30 = vmul.f32 %v565_v27, %v1056_v6  ;;  %v574_v31 = vmul.f32 %v561_v28, %v1044_v0  ;;  %v575_v32 = vmul.f32 %v561_v28, %v1046_v1 }
 0x3c3   : > { %584 = vst [vmem:[%s242_s29 + $0x10] sm:$0xff] %v576_v29  ;;  %585 = vst [vmem:[%s242_s29 + $0x18] sm:$0xff] %v577_v30 }
 0x3c4   : > { %582 = vst [vmem:[%s242_s29] sm:$0xff] %v574_v31  ;;  %583 = vst [vmem:[%s242_s29 + $0x8] sm:$0xff] %v575_v32  ;;  %v569_v23 = vpop.permute.xlu1 %568 }
 0x3c5   : > { %v578_v33 = vmul.f32 %v569_v23, %v1048_v2  ;;  %v579_v5 = vmul.f32 %v569_v23, %v1052_v4 }
 0x3c7   : > { %586 = vst [vmem:[%s242_s29 + $0x20] sm:$0xff] %v578_v33  ;;  %587 = vst [vmem:[%s242_s29 + $0x28] sm:$0xff] %v579_v5 }
 0x3c8   : > { %v573_v0 = vpop.permute.xlu1 %572 }
 0x3c9   : > { %v580_v1 = vmul.f32 %v573_v0, %v1060_v8  ;;  %v581_v2 = vmul.f32 %v573_v0, %v1062_v9 }
 0x3cb   : > { %588 = vst [vmem:[%s242_s29 + $0x30] sm:$0xff] %v580_v1  ;;  %589 = vst [vmem:[%s242_s29 + $0x38] sm:$0xff] %v581_v2 }
 0x3cc   : > { %835 = shalt.err (!%p832_p2)
}
 0x3cd   : > { %s836_s11 = scalar_lea.hbm %s1148_s16, 1024  ;;  %s840_s26 = scalar_lea.hbm %s1199_s5, 2048 }
 0x3ce   : > { %p837_p4 = scmp.ne.s32.totalorder %s1148_s16, %s836_s11  ;;  %p841_p9 = scmp.lt.u32.totalorder %s1148_s16, %s1199_s5 }
 0x3cf   : > { %p842_p1 = scmp.lt.u32.totalorder %s840_s26, %s836_s11  ;;  %p844_p6 = scmp.lt.u32.totalorder %s836_s11, %s1148_s16 }
 0x3d0   : > { %p838_p5 = pnand %p837_p4, %p1208_p11 }
 0x3d1   : > { %p843_p3 = por %p842_p1, %p841_p9 }
 0x3d2   : > { %p839_p7 = pneg %p838_p5 }
 0x3d3   : > { %p845_p12 = por %p844_p6, %p843_p3 }
 0x3d5   : > { %p846_p13 = pnand %p845_p12, %p839_p7 }
 0x3d7   : > { %849 = shalt.err (!%p846_p13)
}
 0x3d8   : > { %s898_s14 = smov 256   ;;  %s899_s25 = smov 16  }
 0x3d9   : > { %728 = dma.vmem_to_hbm [thread:$0]  (%p1208_p11), %s1143_s12, 1024, %s1148_s16, %s591_s22, %s898_s14, %s898_s14, %s899_s25  }
 0x3da PF: > { %s619_s15 = sand.u32 1, %s876_s18   ;;  %p1209_p8 = scmp.ne.s32.totalorder %s1204_s6, 0 }
 0x3db   : > { %p1210_p10 = scmp.ge.s32.totalorder %s888_s21, 2  ;;  %s620_s8 = scalar_lea.sflag [#allocation4], %s619_s15 }
 0x3dd   : > { %p735_p0 = pnand %p1210_p10, %p1209_p8 }
 0x3df   : > { %871 = dma.done.wait (!%p735_p0), %s620_s8, 1024  }
 0x3e0   : > { %873 = vsyncadd (!%p735_p0), %s620_s8, 4294966272  ;;  %p18_p2 = scmp.ge.s32.totalorder %s955_s24, 4   ;;  %s1211_s18 = smov %s880_s19 }
 0x3e1   : > { %s1212_s19 = smov %s884_s20  ;;  %s1213_s20 = smov %s967_s27 }
 0x3e2   : > { %s1214_s21 = smov %s955_s24  ;;  %20 = sbr.rel (!%p18_p2) target bundleno = 5 (0x5), region = 85 }
 0x3e9   :  { %625 = vsyncpa [#allocation3], 1 }
 0x3ea   :  { %627 = vsyncpa [#allocation3 + $0x1], 1 }
 0x3eb   :  { %628 = vsyncpa [#allocation4], 1 }
 0x3ec   :  { %630 = vsyncpa [#allocation4 + $0x1], 1 }

</bundles_post_ra>
